<compile_context>
chip_gen: v5e
topology: v5e:2x2
jax: 0.10.0
libtpu: 0.0.40
codegen_flags: <defaults>
</compile_context>

<pallas_src>
import jax
import jax.numpy as jnp
import numpy as np
from jax.experimental import pallas as pl
from jax.experimental.pallas import tpu as pltpu


# ----------------------------------------------------------------------------
# Config (mirrors the PyTorch module's cfg)
# ----------------------------------------------------------------------------
CFG = {
    "network_size": [25, 50, 100],   # hidden sizes; input feature size is 1
    "bias": True,
    "resnet_dt": True,
    "activation": "tanh",
}

TM_DEFAULT = 2048   # max rows per grid step (sweep 1024/2048/4096)


def _cdiv(a, b):
    return -(-a // b)


def _round_up(a, b):
    return _cdiv(a, b) * b


# ----------------------------------------------------------------------------
# Parameter initialization (deterministic, matches the module's shapes/std)
# ----------------------------------------------------------------------------
def init_params(cfg, key):
    network_size = [1] + list(cfg["network_size"])
    params = []  # flat list: per layer [w, (b), (dt)]
    for i in range(1, len(network_size)):
        nin, nout = network_size[i - 1], network_size[i]
        key, kw, kb, kd = jax.random.split(key, 4)
        w = jax.random.normal(kw, (nin, nout), jnp.float32) * (
            1.0 / np.sqrt(nin + nout)
        )
        params.append(w)
        if cfg["bias"]:
            b = jax.random.normal(kb, (1, nout), jnp.float32) * 1.0
            params.append(b)
        if cfg["resnet_dt"]:
            dt = 1.0 + jax.random.normal(kd, (1, nout), jnp.float32) * 0.001
            params.append(dt)
    return params


# ----------------------------------------------------------------------------
# Layer plan helpers (shared between wrapper and kernel generator)
# ----------------------------------------------------------------------------
def _layer_plan(cfg):
    """Per-layer (n_in, n_out, kind), kind in {'none', 'equal', 'double'}."""
    network_size = [1] + list(cfg["network_size"])
    plan = []
    for i in range(1, len(network_size)):
        n_in, n_out = network_size[i - 1], network_size[i]
        if n_out == n_in:
            kind = "equal"
        elif n_out == 2 * n_in:
            kind = "double"
        else:
            kind = "none"
        plan.append((n_in, n_out, kind))
    return plan


def prepare_kernel_params(params, cfg):
    """Drop dead dt params; add stacked-identity matrices for doubling skips."""
    plan = _layer_plan(cfg)
    use_bias, use_dt = cfg["bias"], cfg["resnet_dt"]
    kparams = []
    idx = 0
    for (n_in, n_out, kind) in plan:
        kparams.append(params[idx]); idx += 1              # W
        if use_bias:
            kparams.append(params[idx]); idx += 1          # b
        dt = None
        if use_dt:
            dt = params[idx]; idx += 1
        if kind in ("equal", "double") and use_dt:
            kparams.append(dt)                             # dt used only on skips
        if kind == "double":
            eye = jnp.eye(n_in, dtype=jnp.float32)
            # cat(x, x) == x @ [I | I]  (exact in f32; runs on the idle MXU)
            kparams.append(jnp.concatenate([eye, eye], axis=1))
    return kparams


# ----------------------------------------------------------------------------
# Pallas kernel (one row tile; full MLP forward)
# ----------------------------------------------------------------------------
def make_embedding_kernel(cfg):
    assert cfg["activation"] == "tanh", "kernel hardcodes tanh"
    plan = _layer_plan(cfg)
    use_bias, use_dt = cfg["bias"], cfg["resnet_dt"]

    def kernel(*refs):
        x_ref = refs[0]
        out_ref = refs[-1]
        p_refs = refs[1:-1]

        x = x_ref[...].astype(jnp.float32)      # (TM, 1)
        idx = 0
        for (n_in, n_out, kind) in plan:
            w = p_refs[idx][...]; idx += 1
            if n_in == 1:
                # K=1 "matmul" is an outer-product broadcast -> VPU,
                # skipping a pointless low-utilization MXU round trip.
                hiden = x * w                   # (TM,1)*(1,N) -> (TM,N)
            else:
                hiden = jnp.dot(x, w, preferred_element_type=jnp.float32)
            if use_bias:
                hiden = hiden + p_refs[idx][...]; idx += 1
            # TODO(synk): optional v7x/v6e bf16 tanh (2x EUP rate) if the
            # 1e-5 tolerance vs the f32 reference can be relaxed; not on v5e.
            hiden = jnp.tanh(hiden)

            if kind == "equal":
                if use_dt:
                    dt = p_refs[idx][...]; idx += 1
                    x = hiden * dt + x
                else:
                    x = hiden + x
            elif kind == "double":
                if use_dt:
                    dt = p_refs[idx][...]; idx += 1
                    hiden = hiden * dt
                s = p_refs[idx][...]; idx += 1  # (n_in, 2*n_in) stacked identity
                # doubling skip cat(x, x) as an MXU matmul instead of a
                # lane-axis concat on the busy VPU/EUP path
                x = hiden + jnp.dot(x, s, preferred_element_type=jnp.float32)
            else:
                x = hiden
        out_ref[...] = x.astype(out_ref.dtype)

    return kernel


# ----------------------------------------------------------------------------
# Tiling: balanced steps, even count (v7x 2-TC), <= 7 dead rows per step
# ----------------------------------------------------------------------------
def _pick_tiling(m, tm_max):
    n_steps = _cdiv(m, tm_max)
    if m >= 16:
        n_steps = max(2, n_steps)     # keep both v7x TensorCores busy
        n_steps += n_steps % 2        # even step count -> balanced TC split
    tm = max(8, _round_up(_cdiv(m, n_steps), 8))
    return n_steps, tm


# ----------------------------------------------------------------------------
# Wrapper
# ----------------------------------------------------------------------------
def embedding_net_forward(x, params, cfg, tm_max=TM_DEFAULT):
    """x: (..., 1) float32 -> (..., network_size[-1]) float32."""
    network_size = [1] + list(cfg["network_size"])
    d_out = network_size[-1]

    lead_shape = x.shape[:-1]
    assert x.shape[-1] == 1
    m = int(np.prod(lead_shape)) if lead_shape else 1
    x2 = x.reshape(m, 1).astype(jnp.float32)

    n_steps, tm = _pick_tiling(m, tm_max)
    m_in = n_steps * tm              # padded input rows (cheap: 4 B/row)
    m_out = _round_up(m, 8)          # output rows; boundary block write-masked
    if m_in != m:
        x2 = jnp.pad(x2, ((0, m_in - m), (0, 0)))

    kparams = prepare_kernel_params(params, cfg)
    kernel = make_embedding_kernel(cfg)

    x_spec = pl.BlockSpec((tm, 1), lambda i: (i, 0))
    # parameters: full-array blocks, same block every grid step (stays resident)
    param_specs = [
        pl.BlockSpec(p.shape, lambda i, _nd=p.ndim: (0,) * _nd) for p in kparams
    ]
    out_spec = pl.BlockSpec((tm, d_out), lambda i: (i, 0))

    plan = _layer_plan(cfg)
    ns = network_size
    m_work = n_steps * tm
    flops = 2 * m_work * sum(ns[i - 1] * ns[i] for i in range(1, len(ns)))
    flops += 2 * m_work * sum(n_in * n_out for (n_in, n_out, k) in plan
                              if k == "double")
    transcendentals = m_work * sum(ns[1:])
    bytes_accessed = (4 * m_in + 4 * m_out * d_out
                      + sum(4 * int(np.prod(p.shape)) for p in kparams))

    out = pl.pallas_call(
        kernel,
        out_shape=jax.ShapeDtypeStruct((m_out, d_out), jnp.float32),
        grid_spec=pltpu.PrefetchScalarGridSpec(
            num_scalar_prefetch=0,
            grid=(n_steps,),
            in_specs=[x_spec] + param_specs,
            out_specs=out_spec,
        ),
        compiler_params=pltpu.CompilerParams(
            dimension_semantics=("parallel",),
        ),
        cost_estimate=pl.CostEstimate(
            flops=flops,
            transcendentals=transcendentals,
            bytes_accessed=bytes_accessed,
        ),
    )(x2, *kparams)

    if m_out != m:                   # only when m % 8 != 0 (tiny slice)
        out = out[:m]
    return out.reshape(*lead_shape, d_out)


# ----------------------------------------------------------------------------
# Pure-JAX reference (consumes the original, unpadded parameter list)
# ----------------------------------------------------------------------------
def embedding_net_ref(x, params, cfg):
    network_size = [1] + list(cfg["network_size"])
    idx = 0
    for i in range(1, len(network_size)):
        w = params[idx]
        idx += 1
        hiden = jnp.matmul(x, w)
        if cfg["bias"]:
            hiden = hiden + params[idx]
            idx += 1
        hiden = jnp.tanh(hiden)
        dt = None
        if cfg["resnet_dt"]:
            dt = params[idx]
            idx += 1
        if network_size[i] == network_size[i - 1]:
            x = hiden * dt + x if cfg["resnet_dt"] else hiden + x
        elif network_size[i] == 2 * network_size[i - 1]:
            xx = jnp.concatenate([x, x], axis=-1)
            x = xx + hiden * dt if cfg["resnet_dt"] else xx + hiden
        else:
            x = hiden
    return x


# ----------------------------------------------------------------------------
# Main
# ----------------------------------------------------------------------------
if __name__ == "__main__":
    key = jax.random.PRNGKey(0)
    kp, kx1, kx2 = jax.random.split(key, 3)

    params = init_params(CFG, kp)

    # small input consistent with the module's forward: trailing feature dim 1
    # (per-neighbor scalar descriptor): batch=2, atoms=8, neighbors=16
    x_small = jax.random.normal(kx1, (2, 8, 16, 1), jnp.float32)
    out_small = jax.block_until_ready(embedding_net_forward(x_small, params, CFG))
    ref_small = embedding_net_ref(x_small, params, CFG)
    np.testing.assert_allclose(
        np.asarray(out_small), np.asarray(ref_small), rtol=1e-5, atol=1e-5
    )
    assert out_small.shape == (2, 8, 16, CFG["network_size"][-1])

    # second shape exercising a balanced 2-step grid with a partial last block
    x_big = jax.random.normal(kx2, (3, 40, 11, 1), jnp.float32)
    out_big = jax.block_until_ready(embedding_net_forward(x_big, params, CFG))
    ref_big = embedding_net_ref(x_big, params, CFG)
    np.testing.assert_allclose(
        np.asarray(out_big), np.asarray(ref_big), rtol=1e-5, atol=1e-5
    )
    assert out_big.shape == (3, 40, 11, CFG["network_size"][-1])

    print("KERNEL_OK")
</pallas_src>

<mosaic_0001>
module attributes {stable_mosaic.version = 11 : i64} {
  func.func @kernel(%arg0: i32, %arg1: memref<128x1xf32, #tpu.memory_space<vmem>>, %arg2: memref<1x25xf32, #tpu.memory_space<vmem>>, %arg3: memref<1x25xf32, #tpu.memory_space<vmem>>, %arg4: memref<25x50xf32, #tpu.memory_space<vmem>>, %arg5: memref<1x50xf32, #tpu.memory_space<vmem>>, %arg6: memref<1x50xf32, #tpu.memory_space<vmem>>, %arg7: memref<25x50xf32, #tpu.memory_space<vmem>>, %arg8: memref<50x100xf32, #tpu.memory_space<vmem>>, %arg9: memref<1x100xf32, #tpu.memory_space<vmem>>, %arg10: memref<1x100xf32, #tpu.memory_space<vmem>>, %arg11: memref<50x100xf32, #tpu.memory_space<vmem>>, %arg12: memref<128x100xf32, #tpu.memory_space<vmem>>) attributes {dimension_semantics = [#tpu.dimension_semantics<parallel>], iteration_bounds = array<i64: 2>, scalar_prefetch = 0 : i64, scratch_operands = 0 : i64, tpu.core_type = #tpu.core_type<tc>, window_params = [{transform_indices = @transform_0, window_bounds = array<i64: 128, 1>}, {pipeline_mode = #tpu.pipeline_mode<synchronous>, transform_indices = @transform_1, window_bounds = array<i64: 1, 25>}, {pipeline_mode = #tpu.pipeline_mode<synchronous>, transform_indices = @transform_2, window_bounds = array<i64: 1, 25>}, {pipeline_mode = #tpu.pipeline_mode<synchronous>, transform_indices = @transform_3, window_bounds = array<i64: 25, 50>}, {pipeline_mode = #tpu.pipeline_mode<synchronous>, transform_indices = @transform_4, window_bounds = array<i64: 1, 50>}, {pipeline_mode = #tpu.pipeline_mode<synchronous>, transform_indices = @transform_5, window_bounds = array<i64: 1, 50>}, {pipeline_mode = #tpu.pipeline_mode<synchronous>, transform_indices = @transform_6, window_bounds = array<i64: 25, 50>}, {pipeline_mode = #tpu.pipeline_mode<synchronous>, transform_indices = @transform_7, window_bounds = array<i64: 50, 100>}, {pipeline_mode = #tpu.pipeline_mode<synchronous>, transform_indices = @transform_8, window_bounds = array<i64: 1, 100>}, {pipeline_mode = #tpu.pipeline_mode<synchronous>, transform_indices = @transform_9, window_bounds = array<i64: 1, 100>}, {pipeline_mode = #tpu.pipeline_mode<synchronous>, transform_indices = @transform_10, window_bounds = array<i64: 50, 100>}, {transform_indices = @transform_11, window_bounds = array<i64: 128, 100>}]} {
    %c0 = arith.constant 0 : index
    %c0_0 = arith.constant 0 : index
    %0 = vector.load %arg1[%c0, %c0_0] : memref<128x1xf32, #tpu.memory_space<vmem>>, vector<128x1xf32>
    %c0_1 = arith.constant 0 : index
    %c0_2 = arith.constant 0 : index
    %1 = vector.load %arg2[%c0_1, %c0_2] : memref<1x25xf32, #tpu.memory_space<vmem>>, vector<1x25xf32>
    %2 = vector.broadcast %0 : vector<128x1xf32> to vector<128x25xf32>
    %3 = vector.broadcast %1 : vector<1x25xf32> to vector<128x25xf32>
    %4 = arith.mulf %2, %3 : vector<128x25xf32>
    %c0_3 = arith.constant 0 : index
    %c0_4 = arith.constant 0 : index
    %5 = vector.load %arg3[%c0_3, %c0_4] : memref<1x25xf32, #tpu.memory_space<vmem>>, vector<1x25xf32>
    %6 = vector.broadcast %5 : vector<1x25xf32> to vector<128x25xf32>
    %7 = arith.addf %4, %6 : vector<128x25xf32>
    %8 = math.tanh %7 : vector<128x25xf32>
    %c0_5 = arith.constant 0 : index
    %c0_6 = arith.constant 0 : index
    %9 = vector.load %arg4[%c0_5, %c0_6] : memref<25x50xf32, #tpu.memory_space<vmem>>, vector<25x50xf32>
    %cst = arith.constant dense<0.000000e+00> : vector<128x50xf32>
    %10 = tpu.matmul %8, %9, %cst {dimension_numbers = #tpu.dot_dimension_numbers<[1], [0], [0], [1], [0, 0, 1, 1], [], []>} : vector<128x25xf32>, vector<25x50xf32>, vector<128x50xf32> -> vector<128x50xf32>
    %c0_7 = arith.constant 0 : index
    %c0_8 = arith.constant 0 : index
    %11 = vector.load %arg5[%c0_7, %c0_8] : memref<1x50xf32, #tpu.memory_space<vmem>>, vector<1x50xf32>
    %12 = vector.broadcast %11 : vector<1x50xf32> to vector<128x50xf32>
    %13 = arith.addf %10, %12 : vector<128x50xf32>
    %14 = math.tanh %13 : vector<128x50xf32>
    %c0_9 = arith.constant 0 : index
    %c0_10 = arith.constant 0 : index
    %15 = vector.load %arg6[%c0_9, %c0_10] : memref<1x50xf32, #tpu.memory_space<vmem>>, vector<1x50xf32>
    %16 = vector.broadcast %15 : vector<1x50xf32> to vector<128x50xf32>
    %17 = arith.mulf %14, %16 : vector<128x50xf32>
    %c0_11 = arith.constant 0 : index
    %c0_12 = arith.constant 0 : index
    %18 = vector.load %arg7[%c0_11, %c0_12] : memref<25x50xf32, #tpu.memory_space<vmem>>, vector<25x50xf32>
    %cst_13 = arith.constant dense<0.000000e+00> : vector<128x50xf32>
    %19 = tpu.matmul %8, %18, %cst_13 {dimension_numbers = #tpu.dot_dimension_numbers<[1], [0], [0], [1], [0, 0, 1, 1], [], []>} : vector<128x25xf32>, vector<25x50xf32>, vector<128x50xf32> -> vector<128x50xf32>
    %20 = arith.addf %17, %19 : vector<128x50xf32>
    %c0_14 = arith.constant 0 : index
    %c0_15 = arith.constant 0 : index
    %21 = vector.load %arg8[%c0_14, %c0_15] : memref<50x100xf32, #tpu.memory_space<vmem>>, vector<50x100xf32>
    %cst_16 = arith.constant dense<0.000000e+00> : vector<128x100xf32>
    %22 = tpu.matmul %20, %21, %cst_16 {dimension_numbers = #tpu.dot_dimension_numbers<[1], [0], [0], [1], [0, 0, 1, 1], [], []>} : vector<128x50xf32>, vector<50x100xf32>, vector<128x100xf32> -> vector<128x100xf32>
    %c0_17 = arith.constant 0 : index
    %c0_18 = arith.constant 0 : index
    %23 = vector.load %arg9[%c0_17, %c0_18] : memref<1x100xf32, #tpu.memory_space<vmem>>, vector<1x100xf32>
    %24 = vector.broadcast %23 : vector<1x100xf32> to vector<128x100xf32>
    %25 = arith.addf %22, %24 : vector<128x100xf32>
    %26 = math.tanh %25 : vector<128x100xf32>
    %c0_19 = arith.constant 0 : index
    %c0_20 = arith.constant 0 : index
    %27 = vector.load %arg10[%c0_19, %c0_20] : memref<1x100xf32, #tpu.memory_space<vmem>>, vector<1x100xf32>
    %28 = vector.broadcast %27 : vector<1x100xf32> to vector<128x100xf32>
    %29 = arith.mulf %26, %28 : vector<128x100xf32>
    %c0_21 = arith.constant 0 : index
    %c0_22 = arith.constant 0 : index
    %30 = vector.load %arg11[%c0_21, %c0_22] : memref<50x100xf32, #tpu.memory_space<vmem>>, vector<50x100xf32>
    %cst_23 = arith.constant dense<0.000000e+00> : vector<128x100xf32>
    %31 = tpu.matmul %20, %30, %cst_23 {dimension_numbers = #tpu.dot_dimension_numbers<[1], [0], [0], [1], [0, 0, 1, 1], [], []>} : vector<128x50xf32>, vector<50x100xf32>, vector<128x100xf32> -> vector<128x100xf32>
    %32 = arith.addf %29, %31 : vector<128x100xf32>
    %c0_24 = arith.constant 0 : index
    %c0_25 = arith.constant 0 : index
    %33 = vector.load %arg12[%c0_24, %c0_25] : memref<128x100xf32, #tpu.memory_space<vmem>>, vector<128x100xf32>
    tpu.vector_store %arg12[%c0_24, %c0_25], %32 {strides = array<i32>} : memref<128x100xf32, #tpu.memory_space<vmem>>, vector<128x100xf32>,
    return
  }
  func.func @transform_0(%arg0: i32) -> (i32, i32) {
    %c0_i32 = arith.constant 0 : i32
    %c0_i32_0 = arith.constant 0 : i32
    return %arg0, %c0_i32 : i32, i32
  }
  func.func @transform_1(%arg0: i32) -> (i32, i32) {
    %c0_i32 = arith.constant 0 : i32
    %c0_i32_0 = arith.constant 0 : i32
    %c0_i32_1 = arith.constant 0 : i32
    return %c0_i32, %c0_i32_0 : i32, i32
  }
  func.func @transform_2(%arg0: i32) -> (i32, i32) {
    %c0_i32 = arith.constant 0 : i32
    %c0_i32_0 = arith.constant 0 : i32
    %c0_i32_1 = arith.constant 0 : i32
    return %c0_i32, %c0_i32_0 : i32, i32
  }
  func.func @transform_3(%arg0: i32) -> (i32, i32) {
    %c0_i32 = arith.constant 0 : i32
    %c0_i32_0 = arith.constant 0 : i32
    %c0_i32_1 = arith.constant 0 : i32
    return %c0_i32, %c0_i32_0 : i32, i32
  }
  func.func @transform_4(%arg0: i32) -> (i32, i32) {
    %c0_i32 = arith.constant 0 : i32
    %c0_i32_0 = arith.constant 0 : i32
    %c0_i32_1 = arith.constant 0 : i32
    return %c0_i32, %c0_i32_0 : i32, i32
  }
  func.func @transform_5(%arg0: i32) -> (i32, i32) {
    %c0_i32 = arith.constant 0 : i32
    %c0_i32_0 = arith.constant 0 : i32
    %c0_i32_1 = arith.constant 0 : i32
    return %c0_i32, %c0_i32_0 : i32, i32
  }
  func.func @transform_6(%arg0: i32) -> (i32, i32) {
    %c0_i32 = arith.constant 0 : i32
    %c0_i32_0 = arith.constant 0 : i32
    %c0_i32_1 = arith.constant 0 : i32
    return %c0_i32, %c0_i32_0 : i32, i32
  }
  func.func @transform_7(%arg0: i32) -> (i32, i32) {
    %c0_i32 = arith.constant 0 : i32
    %c0_i32_0 = arith.constant 0 : i32
    %c0_i32_1 = arith.constant 0 : i32
    return %c0_i32, %c0_i32_0 : i32, i32
  }
  func.func @transform_8(%arg0: i32) -> (i32, i32) {
    %c0_i32 = arith.constant 0 : i32
    %c0_i32_0 = arith.constant 0 : i32
    %c0_i32_1 = arith.constant 0 : i32
    return %c0_i32, %c0_i32_0 : i32, i32
  }
  func.func @transform_9(%arg0: i32) -> (i32, i32) {
    %c0_i32 = arith.constant 0 : i32
    %c0_i32_0 = arith.constant 0 : i32
    %c0_i32_1 = arith.constant 0 : i32
    return %c0_i32, %c0_i32_0 : i32, i32
  }
  func.func @transform_10(%arg0: i32) -> (i32, i32) {
    %c0_i32 = arith.constant 0 : i32
    %c0_i32_0 = arith.constant 0 : i32
    %c0_i32_1 = arith.constant 0 : i32
    return %c0_i32, %c0_i32_0 : i32, i32
  }
  func.func @transform_11(%arg0: i32) -> (i32, i32) {
    %c0_i32 = arith.constant 0 : i32
    %c0_i32_0 = arith.constant 0 : i32
    return %arg0, %c0_i32 : i32, i32
  }
}

</mosaic_0001>

<bundles_post_ra>
// kernel: tpu_custom_call.1
= control target key start
LH: loop header
LB: loop body
LE: loop exit
PB: predicated region body
PF: predicated region fallthrough
CT: control target
= control target key end

     0   :  { %s1383_s17 = smov 0   ;;  %s1727_s0 = inlined_call_operand.vmem [shape: f32[256,1], index: 0, kind: input, shape index: {}]   ;;  %s1728_s1 = inlined_call_operand.vmem [shape: f32[1,25], index: 1, kind: input, shape index: {}]   ;;  %s1729_s2 = inlined_call_operand.vmem [shape: f32[1,25], index: 2, kind: input, shape index: {}]   ;;  %s1730_s3 = inlined_call_operand.vmem [shape: f32[25,50], index: 3, kind: input, shape index: {}]   ;;  %s1731_s4 = inlined_call_operand.vmem [shape: f32[1,50], index: 4, kind: input, shape index: {}]   ;;  %s1732_s5 = inlined_call_operand.vmem [shape: f32[1,50], index: 5, kind: input, shape index: {}]   ;;  %s1733_s6 = inlined_call_operand.vmem [shape: f32[25,50], index: 6, kind: input, shape index: {}]   ;;  %s1734_s7 = inlined_call_operand.vmem [shape: f32[50,100], index: 7, kind: input, shape index: {}]   ;;  %s1735_s8 = inlined_call_operand.vmem [shape: f32[1,100], index: 8, kind: input, shape index: {}]   ;;  %s1736_s9 = inlined_call_operand.vmem [shape: f32[1,100], index: 9, kind: input, shape index: {}]   ;;  %s1737_s10 = inlined_call_operand.vmem [shape: f32[50,100], index: 10, kind: input, shape index: {}]   ;;  %s1738_s11 = inlined_call_operand.vmem [shape: f32[256,100], index: 11, kind: output, shape index: {}]  }
   0x1 LB: > { %s1121_s18 = sadd.s32 4294967295, %s1320_s17   ;;  %p1125_p0 = scmp.ge.s32.totalorder %s1320_s17, 1  ;;  %s1320_s17 = sphi %s1383_s17, %s21_s17  }
   0x2   : > { %p338_p1 = scmp.lt.s32.totalorder %s1320_s17, 3 }
   0x4   : > { %p339_p2 = pnand %p1125_p0, %p338_p1 }
   0x5   : > { %s1126_s19 = sshll.u32 (!%p339_p2), %s1121_s18, 4 }
   0x6   : > { %342 = sbr.rel (%p339_p2) target bundleno = 546 (0x222), region = 64  ;;  %p379_p3 = scmp.lt.s32.totalorder (!%p339_p2), %s1126_s19, 31 }
   0xb   : > { %v1322_v0 = vmov 0   ;;  %s1740_s19 = smov (!%p379_p3, %s1126_s19), 31  ;;  %v545_v17 = vld [vmem:[%s1730_s3 + $0x18] sm:$0x1]  ;;  %vm599_vm0 = vcmask 1040384   ;;  %v544_v19 = vld [vmem:[%s1730_s3 + $0x10] sm:$0xff] }
   0xc   : > { %1210 = vset.pattern.permute.xlu1 %v1322_v0  ;;  %1209 = vset.pattern.permute.xlu0 %v1322_v0  ;;  %s1127_s20 = sshll.u32 %s1740_s19, 3  ;;  %v707_v18 = vld [vmem:[%s1733_s6 + $0x18] sm:$0x1]  ;;  %v706_v20 = vld [vmem:[%s1733_s6 + $0x10] sm:$0xff]  ;;  %v543_v21 = vld [vmem:[%s1730_s3 + $0x8] sm:$0xff]  ;;  %vm550_vm1 = vcmask 203776  }
   0xd   : > { %1211 = vset.pattern.permute.xlu2 %v1322_v0  ;;  %s1399_s23 = scalar_lea.vmem %s1727_s0, %s1127_s20  ;;  %1130 = vmatpush.msk.msra.mxu0 %vm599_vm0, %v545_v17  ;;  %v705_v22 = vld [vmem:[%s1733_s6 + $0x8] sm:$0xff]  ;;  %v542_v24 = vld [vmem:[%s1730_s3] sm:$0xff]  ;;  %vm852_vm2 = vcmask 1041408   ;;  %vm803_vm3 = vcmask 408576   ;;  %s1661_s15 = scalar_lea.vmem %s1738_s11, %s1127_s20  ;;  %vm1048_vm4 = vcmask 818176  }
   0xe   : > { %v392_v1 = vld [vmem:[%s1399_s23 + $0x10] sm:$0xff]  ;;  %v390_v2 = vld [vmem:[%s1399_s23] sm:$0xff]  ;;  %v393_v4 = vld [vmem:[%s1399_s23 + $0x18] sm:$0xff]  ;;  %1147 = vmatpush.msk.msra.mxu1 %vm599_vm0, %v707_v18 }
   0xf   : > { %419 = vperm.xlu1 %1210, %v392_v1   ;;  %409 = vperm.xlu0 %1209, %v390_v2   ;;  %v394_v3 = vld [vmem:[%s1399_s23 + $0x20] sm:$0xff]  ;;  %v391_v5 = vld [vmem:[%s1399_s23 + $0x8] sm:$0xff]  ;;  %v397_v7 = vld [vmem:[%s1399_s23 + $0x38] sm:$0xff] }
  0x10   : > { %429 = vperm.xlu2 %1211, %v394_v3   ;;  %v395_v6 = vld [vmem:[%s1399_s23 + $0x28] sm:$0xff]  ;;  %v396_v8 = vld [vmem:[%s1399_s23 + $0x30] sm:$0xff]  ;;  %v398_v9 = vld [vmem:[%s1399_s23 + $0x40] sm:$0xff]  ;;  %616 = vmatpush.msra.mxu0 %v544_v19 }
  0x11   : > { %v400_v10 = vld [vmem:[%s1399_s23 + $0x50] sm:$0xff]  ;;  %v399_v11 = vld [vmem:[%s1399_s23 + $0x48] sm:$0xff]  ;;  %v401_v12 = vld [vmem:[%s1399_s23 + $0x58] sm:$0xff]  ;;  %724 = vmatpush.msra.mxu1 %v706_v20 }
  0x12   : > { %v403_v13 = vld [vmem:[%s1399_s23 + $0x68] sm:$0xff]  ;;  %v402_v14 = vld [vmem:[%s1399_s23 + $0x60] sm:$0xff]  ;;  %v404_v15 = vld [vmem:[%s1399_s23 + $0x70] sm:$0xff]  ;;  %617 = vmatpush.msra.mxu0 %v543_v21 }
  0x13   : > { %v405_v16 = vld [vmem:[%s1399_s23 + $0x78] sm:$0xff]  ;;  %725 = vmatpush.msra.mxu1 %v705_v22  ;;  %v704_v25 = vld [vmem:[%s1733_s6] sm:$0xff] }
  0x14   : > { %618 = vmatpush.msra.mxu0 %v542_v24  ;;  %v1444_v27 = vld [vmem:[%s1728_s1] ss:$0 sm:$0xff]  ;;  %v963_v24 = vld [vmem:[%s1737_s10 + $0x30] sm:$0x3] }
  0x15   : > { %726 = vmatpush.msra.mxu1 %v704_v25  ;;  %v1449_v29 = vld [vmem:[%s1729_s2] ss:$0 sm:$0xff]  ;;  %1181 = vmatpush.msk.msra.mxu3 %vm852_vm2, %v963_v24 }
  0x17   : > { %424 = vperm.xlu1 %1210, %v393_v4   ;;  %414 = vperm.xlu0 %1209, %v391_v5  }
  0x18   : > { %434 = vperm.xlu2 %1211, %v395_v6  }
  0x1f   : > { %444 = vperm.xlu1 %1210, %v397_v7   ;;  %439 = vperm.xlu0 %1209, %v396_v8  }
  0x20   : > { %449 = vperm.xlu2 %1211, %v398_v9  }
  0x27   : > { %459 = vperm.xlu1 %1210, %v400_v10   ;;  %454 = vperm.xlu0 %1209, %v399_v11  }
  0x28   : > { %464 = vperm.xlu2 %1211, %v401_v12  }
  0x2f   : > { %474 = vperm.xlu1 %1210, %v403_v13   ;;  %469 = vperm.xlu0 %1209, %v402_v14  }
  0x30   : > { %479 = vperm.xlu2 %1211, %v404_v15  }
  0x37   : > { %484 = vperm.xlu0 %1209, %v405_v16  }
  0x6a   : > { %v430_v23 = vpop.permute.xlu2 %429 }
  0x6b   : > { %v494_v61 = vmul.f32 %v1444_v27, %v430_v23  ;;  %v798_v23 = vld [vmem:[%s1734_s7 + $0x30] sm:$0x3] }
  0x6c   : > { %1164 = vmatpush.msk.msra.mxu2 %vm852_vm2, %v798_v23 }
  0x6d   : > { %v514_v62 = vadd.f32 %v1449_v29, %v494_v61 }
  0x72   : > { %v435_v26 = vpop.permute.xlu2 %434 }
  0x73   : > { %v495_v6 = vmul.f32 %v1444_v27, %v435_v26  ;;  %v797_v26 = vld [vmem:[%s1734_s7 + $0x28] sm:$0xff] }
  0x74   : > { %866 = vmatpush.msra.mxu2 %v797_v26 }
  0x75   : > { %v515_v10 = vadd.f32 %v1449_v29, %v495_v6 }
  0x7a   : > { %v450_v28 = vpop.permute.xlu2 %449 }
  0x7b   : > { %v498_v30 = vmul.f32 %v1444_v27, %v450_v28  ;;  %v796_v28 = vld [vmem:[%s1734_s7 + $0x20] sm:$0xff] }
  0x7c   : > { %867 = vmatpush.msra.mxu2 %v796_v28 }
  0x7d   : > { %v1453_v31 = vadd.f32 %v1449_v29, %v498_v30  ;;  %v795_v30 = vld [vmem:[%s1734_s7 + $0x18] sm:$0xff] }
  0x7e   : > { %868 = vmatpush.msra.mxu2 %v795_v30 }
  0x81   : > { %v420_v32 = vpop.permute.xlu1 %419  ;;  %v410_v33 = vpop.permute.xlu0 %409 }
  0x82   : > { %v490_v34 = vmul.f32 %v1444_v27, %v410_v33  ;;  %v465_v35 = vpop.permute.xlu2 %464  ;;  %v492_v46 = vmul.f32 %v1444_v27, %v420_v32  ;;  %v794_v32 = vld [vmem:[%s1734_s7 + $0x10] sm:$0xff] }
  0x83   : > { %v501_v37 = vmul.f32 %v1444_v27, %v465_v35  ;;  %v959_v33 = vld [vmem:[%s1737_s10 + $0x10] sm:$0xff]  ;;  %869 = vmatpush.msra.mxu2 %v794_v32  ;;  %v793_v35 = vld [vmem:[%s1734_s7 + $0x8] sm:$0xff] }
  0x84   : > { %v510_v36 = vadd.f32 %v1449_v29, %v490_v34  ;;  %v512_v48 = vadd.f32 %v1449_v29, %v492_v46 }
  0x85   : > { %v1459_v38 = vadd.f32 %v1449_v29, %v501_v37  ;;  %870 = vmatpush.msra.mxu2 %v793_v35  ;;  %v792_v37 = vld [vmem:[%s1734_s7] sm:$0xff] }
  0x86   : > { %1218 = vtanh.f32 %v510_v36  ;;  %v958_v36 = vld [vmem:[%s1737_s10 + $0x8] sm:$0xff] }
  0x87   : > { %871 = vmatpush.msra.mxu2 %v792_v37 }
  0x89   : > { %v425_v39 = vpop.permute.xlu1 %424  ;;  %v415_v40 = vpop.permute.xlu0 %414 }
  0x8a   : > { %v491_v41 = vmul.f32 %v1444_v27, %v415_v40  ;;  %v480_v42 = vpop.permute.xlu2 %479  ;;  %v493_v52 = vmul.f32 %v1444_v27, %v425_v39 }
  0x8b   : > { %v504_v44 = vmul.f32 %v1444_v27, %v480_v42 }
  0x8c   : > { %v511_v43 = vadd.f32 %v1449_v29, %v491_v41  ;;  %v1219_v45 = vpop.eup %1218  ;;  %v513_v58 = vadd.f32 %v1449_v29, %v493_v52  ;;  %v1572_v41 = vld [vmem:[%s1731_s4] ss:$0 sm:$0xff] }
  0x8d   : > { %1131 = vmatmul.msk.f32.vlgmr.msra.gmra.mxu0 %vm550_vm1, %v1219_v45  ;;  %1148 = vmatmul.msk.f32.vlgmr.msra.gmra.mxu1 %vm550_vm1, %v1219_v45  ;;  %v1468_v47 = vadd.f32 %v1449_v29, %v504_v44  ;;  %v1578_v45 = vld [vmem:[%s1732_s5] ss:$0 sm:$0xff] }
  0x8e   : > { %1220 = vtanh.f32 %v511_v43 }
  0x8f   : > { %1222 = vtanh.f32 %v512_v48 }
  0x90   : > { %1224 = vtanh.f32 %v513_v58 }
  0x91   : > { %v445_v49 = vpop.permute.xlu1 %444  ;;  %v440_v50 = vpop.permute.xlu0 %439  ;;  %1226 = vtanh.f32 %v514_v62 }
  0x92   : > { %1228 = vtanh.f32 %v515_v10  ;;  %v496_v12 = vmul.f32 %v1444_v27, %v440_v50  ;;  %v497_v15 = vmul.f32 %v1444_v27, %v445_v49 }
  0x94   : > { %v1221_v51 = vpop.eup %1220  ;;  %v516_v13 = vadd.f32 %v1449_v29, %v496_v12  ;;  %v517_v16 = vadd.f32 %v1449_v29, %v497_v15 }
  0x95   : > { %1132 = vmatmul.msk.f32.gmra.mxu0 %vm550_vm1, %v1221_v51  ;;  %1149 = vmatmul.msk.f32.gmra.mxu1 %vm550_vm1, %v1221_v51  ;;  %v1223_v57 = vpop.eup %1222 }
  0x96   : > { %v1225_v5 = vpop.eup %1224  ;;  %1230 = vtanh.f32 %v516_v13 }
  0x97   : > { %v1227_v9 = vpop.eup %1226  ;;  %1232 = vtanh.f32 %v517_v16 }
  0x98   : > { %v1229_v14 = vpop.eup %1228  ;;  %1234 = vtanh.f32 %v1453_v31  ;;  %v960_v31 = vld [vmem:[%s1737_s10 + $0x18] sm:$0xff] }
  0x99   : > { %v460_v53 = vpop.permute.xlu1 %459  ;;  %v455_v54 = vpop.permute.xlu0 %454 }
  0x9a   : > { %v500_v55 = vmul.f32 %v1444_v27, %v460_v53  ;;  %v499_v56 = vmul.f32 %v1444_v27, %v455_v54 }
  0x9c   : > { %v520_v59 = vadd.f32 %v1449_v29, %v500_v55  ;;  %v519_v60 = vadd.f32 %v1449_v29, %v499_v56  ;;  %v1231_v17 = vpop.eup %1230 }
  0x9d   : > { %1133 = vmatmul.msk.f32.gmra.mxu0 %vm550_vm1, %v1223_v57  ;;  %1150 = vmatmul.msk.f32.gmra.mxu1 %vm550_vm1, %v1223_v57  ;;  %v1233_v18 = vpop.eup %1232 }
  0x9e   : > { %v1235_v19 = vpop.eup %1234  ;;  %1236 = vtanh.f32 %v519_v60 }
  0x9f   : > { %1238 = vtanh.f32 %v520_v59 }
  0xa0   : > { %1240 = vtanh.f32 %v1459_v38  ;;  %v957_v38 = vld [vmem:[%s1737_s10] sm:$0xff] }
  0xa1   : > { %v475_v63 = vpop.permute.xlu1 %474  ;;  %v470_v0 = vpop.permute.xlu0 %469 }
  0xa2   : > { %v503_v1 = vmul.f32 %v1444_v27, %v475_v63  ;;  %v502_v2 = vmul.f32 %v1444_v27, %v470_v0 }
  0xa4   : > { %v523_v3 = vadd.f32 %v1449_v29, %v503_v1  ;;  %v522_v4 = vadd.f32 %v1449_v29, %v502_v2  ;;  %v1237_v20 = vpop.eup %1236 }
  0xa5   : > { %1134 = vmatmul.msk.f32.gmra.mxu0 %vm550_vm1, %v1225_v5  ;;  %1151 = vmatmul.msk.f32.gmra.mxu1 %vm550_vm1, %v1225_v5  ;;  %v1239_v21 = vpop.eup %1238 }
  0xa6   : > { %v1241_v22 = vpop.eup %1240  ;;  %1242 = vtanh.f32 %v522_v4 }
  0xa7   : > { %1244 = vtanh.f32 %v523_v3 }
  0xa8   : > { %1246 = vtanh.f32 %v1468_v47 }
  0xa9   : > { %v485_v7 = vpop.permute.xlu0 %484 }
  0xaa   : > { %v505_v8 = vmul.f32 %v1444_v27, %v485_v7  ;;  %v962_v27 = vld [vmem:[%s1737_s10 + $0x28] sm:$0xff] }
  0xab   : > { %977 = vmatpush.msra.mxu3 %v962_v27 }
  0xac   : > { %v1493_v11 = vadd.f32 %v1449_v29, %v505_v8  ;;  %v1243_v25 = vpop.eup %1242  ;;  %v961_v29 = vld [vmem:[%s1737_s10 + $0x20] sm:$0xff] }
  0xad   : > { %1135 = vmatmul.msk.f32.gmra.mxu0 %vm550_vm1, %v1227_v9  ;;  %1152 = vmatmul.msk.f32.gmra.mxu1 %vm550_vm1, %v1227_v9  ;;  %v1245_v34 = vpop.eup %1244 }
  0xae   : > { %978 = vmatpush.msra.mxu3 %v961_v29  ;;  %v1247_v39 = vpop.eup %1246  ;;  %1248 = vtanh.f32 %v1493_v11 }
  0xb0   : > { %979 = vmatpush.msra.mxu3 %v960_v31 }
  0xb2   : > { %980 = vmatpush.msra.mxu3 %v959_v33 }
  0xb4   : > { %981 = vmatpush.msra.mxu3 %v958_v36  ;;  %v1249_v40 = vpop.eup %1248 }
  0xb5   : > { %1136 = vmatmul.msk.f32.gmra.mxu0 %vm550_vm1, %v1229_v14  ;;  %1153 = vmatmul.msk.f32.gmra.mxu1 %vm550_vm1, %v1229_v14 }
  0xb6   : > { %982 = vmatpush.msra.mxu3 %v957_v38 }
  0xbd   : > { %1137 = vmatmul.msk.f32.gmra.mxu0 %vm550_vm1, %v1231_v17  ;;  %1154 = vmatmul.msk.f32.gmra.mxu1 %vm550_vm1, %v1231_v17 }
  0xc5   : > { %1138 = vmatmul.msk.f32.gmra.mxu0 %vm550_vm1, %v1233_v18  ;;  %1155 = vmatmul.msk.f32.gmra.mxu1 %vm550_vm1, %v1233_v18 }
  0xcd   : > { %1139 = vmatmul.msk.f32.gmra.mxu0 %vm550_vm1, %v1235_v19  ;;  %1156 = vmatmul.msk.f32.gmra.mxu1 %vm550_vm1, %v1235_v19 }
  0xd5   : > { %1140 = vmatmul.msk.f32.gmra.mxu0 %vm550_vm1, %v1237_v20  ;;  %1157 = vmatmul.msk.f32.gmra.mxu1 %vm550_vm1, %v1237_v20 }
  0xdd   : > { %1141 = vmatmul.msk.f32.gmra.mxu0 %vm550_vm1, %v1239_v21  ;;  %1158 = vmatmul.msk.f32.gmra.mxu1 %vm550_vm1, %v1239_v21 }
  0xe5   : > { %1142 = vmatmul.msk.f32.gmra.mxu0 %vm550_vm1, %v1241_v22  ;;  %1159 = vmatmul.msk.f32.gmra.mxu1 %vm550_vm1, %v1241_v22 }
  0xed   : > { %1143 = vmatmul.msk.f32.gmra.mxu0 %vm550_vm1, %v1243_v25  ;;  %1160 = vmatmul.msk.f32.gmra.mxu1 %vm550_vm1, %v1243_v25 }
  0xf5   : > { %1144 = vmatmul.msk.f32.gmra.mxu0 %vm550_vm1, %v1245_v34  ;;  %1161 = vmatmul.msk.f32.gmra.mxu1 %vm550_vm1, %v1245_v34 }
  0xfd   : > { %1145 = vmatmul.msk.f32.gmra.mxu0 %vm550_vm1, %v1247_v39  ;;  %1162 = vmatmul.msk.f32.gmra.mxu1 %vm550_vm1, %v1247_v39 }
 0x105   : > { %1146 = vmatmul.msk.f32.gmra.mxu0 %vm550_vm1, %v1249_v40  ;;  %1163 = vmatmul.msk.f32.gmra.mxu1 %vm550_vm1, %v1249_v40 }
 0x10a   : > { %v620_v42 = vpop.f32.mrf.mxu0  ;;  %v728_v43 = vpop.f32.mrf.mxu1 }
 0x10b   : > { %v621_v44 = vadd.f32 %v1572_v41, %v620_v42 }
 0x10d   : > { %1250 = vtanh.f32 %v621_v44 }
 0x112   : > { %v623_v46 = vpop.f32.mrf.mxu0  ;;  %v731_v47 = vpop.f32.mrf.mxu1 }
 0x113   : > { %v1251_v48 = vpop.eup %1250  ;;  %v624_v49 = vadd.f32 %v1572_v41, %v623_v46 }
 0x114   : > { %v688_v50 = vmul.f32 %v1251_v48, %v1578_v45 }
 0x115   : > { %1252 = vtanh.f32 %v624_v49 }
 0x116   : > { %v776_v51 = vadd.f32 %v728_v43, %v688_v50 }
 0x118   : > { %1165 = vmatmul.msk.f32.vlgmr.msra.gmra.mxu2 %vm803_vm3, %v776_v51  ;;  %1182 = vmatmul.msk.f32.vlgmr.msra.gmra.mxu3 %vm803_vm3, %v776_v51 }
 0x11a   : > { %v626_v52 = vpop.f32.mrf.mxu0  ;;  %v734_v53 = vpop.f32.mrf.mxu1 }
 0x11b   : > { %v1253_v54 = vpop.eup %1252  ;;  %v627_v55 = vadd.f32 %v1572_v41, %v626_v52 }
 0x11c   : > { %v689_v56 = vmul.f32 %v1253_v54, %v1578_v45 }
 0x11d   : > { %1254 = vtanh.f32 %v627_v55 }
 0x11e   : > { %v777_v57 = vadd.f32 %v731_v47, %v689_v56 }
 0x120   : > { %1166 = vmatmul.msk.f32.gmra.mxu2 %vm803_vm3, %v777_v57  ;;  %1183 = vmatmul.msk.f32.gmra.mxu3 %vm803_vm3, %v777_v57 }
 0x122   : > { %v629_v58 = vpop.f32.mrf.mxu0  ;;  %v737_v59 = vpop.f32.mrf.mxu1 }
 0x123   : > { %v1255_v60 = vpop.eup %1254  ;;  %v630_v61 = vadd.f32 %v1572_v41, %v629_v58 }
 0x124   : > { %v690_v62 = vmul.f32 %v1255_v60, %v1578_v45 }
 0x125   : > { %1256 = vtanh.f32 %v630_v61 }
 0x126   : > { %v778_v63 = vadd.f32 %v734_v53, %v690_v62 }
 0x128   : > { %1167 = vmatmul.msk.f32.gmra.mxu2 %vm803_vm3, %v778_v63  ;;  %1184 = vmatmul.msk.f32.gmra.mxu3 %vm803_vm3, %v778_v63 }
 0x12a   : > { %v632_v0 = vpop.f32.mrf.mxu0  ;;  %v740_v1 = vpop.f32.mrf.mxu1 }
 0x12b   : > { %v1257_v2 = vpop.eup %1256  ;;  %v633_v3 = vadd.f32 %v1572_v41, %v632_v0 }
 0x12c   : > { %v691_v4 = vmul.f32 %v1257_v2, %v1578_v45 }
 0x12d   : > { %1258 = vtanh.f32 %v633_v3 }
 0x12e   : > { %v779_v5 = vadd.f32 %v737_v59, %v691_v4 }
 0x130   : > { %1168 = vmatmul.msk.f32.gmra.mxu2 %vm803_vm3, %v779_v5  ;;  %1185 = vmatmul.msk.f32.gmra.mxu3 %vm803_vm3, %v779_v5 }
 0x132   : > { %v635_v6 = vpop.f32.mrf.mxu0  ;;  %v743_v7 = vpop.f32.mrf.mxu1 }
 0x133   : > { %v1259_v8 = vpop.eup %1258  ;;  %v636_v9 = vadd.f32 %v1572_v41, %v635_v6 }
 0x134   : > { %v692_v10 = vmul.f32 %v1259_v8, %v1578_v45 }
 0x135   : > { %1260 = vtanh.f32 %v636_v9 }
 0x136   : > { %v780_v11 = vadd.f32 %v740_v1, %v692_v10 }
 0x138   : > { %1169 = vmatmul.msk.f32.gmra.mxu2 %vm803_vm3, %v780_v11  ;;  %1186 = vmatmul.msk.f32.gmra.mxu3 %vm803_vm3, %v780_v11 }
 0x13a   : > { %v638_v12 = vpop.f32.mrf.mxu0  ;;  %v746_v13 = vpop.f32.mrf.mxu1 }
 0x13b   : > { %v1261_v14 = vpop.eup %1260  ;;  %v639_v15 = vadd.f32 %v1572_v41, %v638_v12 }
 0x13c   : > { %v693_v16 = vmul.f32 %v1261_v14, %v1578_v45 }
 0x13d   : > { %1262 = vtanh.f32 %v639_v15 }
 0x13e   : > { %v781_v17 = vadd.f32 %v743_v7, %v693_v16 }
 0x140   : > { %1170 = vmatmul.msk.f32.gmra.mxu2 %vm803_vm3, %v781_v17  ;;  %1187 = vmatmul.msk.f32.gmra.mxu3 %vm803_vm3, %v781_v17 }
 0x142   : > { %v641_v18 = vpop.f32.mrf.mxu0  ;;  %v749_v19 = vpop.f32.mrf.mxu1 }
 0x143   : > { %v1263_v20 = vpop.eup %1262  ;;  %v642_v21 = vadd.f32 %v1572_v41, %v641_v18 }
 0x144   : > { %v694_v22 = vmul.f32 %v1263_v20, %v1578_v45 }
 0x145   : > { %1264 = vtanh.f32 %v642_v21 }
 0x146   : > { %v782_v23 = vadd.f32 %v746_v13, %v694_v22 }
 0x148   : > { %1171 = vmatmul.msk.f32.gmra.mxu2 %vm803_vm3, %v782_v23  ;;  %1188 = vmatmul.msk.f32.gmra.mxu3 %vm803_vm3, %v782_v23 }
 0x14a   : > { %v644_v24 = vpop.f32.mrf.mxu0  ;;  %v752_v25 = vpop.f32.mrf.mxu1 }
 0x14b   : > { %v1265_v26 = vpop.eup %1264  ;;  %v645_v27 = vadd.f32 %v1572_v41, %v644_v24 }
 0x14c   : > { %v695_v28 = vmul.f32 %v1265_v26, %v1578_v45 }
 0x14d   : > { %1266 = vtanh.f32 %v645_v27 }
 0x14e   : > { %v783_v29 = vadd.f32 %v749_v19, %v695_v28 }
 0x150   : > { %1172 = vmatmul.msk.f32.gmra.mxu2 %vm803_vm3, %v783_v29  ;;  %1189 = vmatmul.msk.f32.gmra.mxu3 %vm803_vm3, %v783_v29 }
 0x152   : > { %v647_v30 = vpop.f32.mrf.mxu0  ;;  %v755_v31 = vpop.f32.mrf.mxu1 }
 0x153   : > { %v1267_v32 = vpop.eup %1266  ;;  %v648_v33 = vadd.f32 %v1572_v41, %v647_v30 }
 0x154   : > { %v696_v34 = vmul.f32 %v1267_v32, %v1578_v45 }
 0x155   : > { %1268 = vtanh.f32 %v648_v33 }
 0x156   : > { %v784_v35 = vadd.f32 %v752_v25, %v696_v34 }
 0x158   : > { %1173 = vmatmul.msk.f32.gmra.mxu2 %vm803_vm3, %v784_v35  ;;  %1190 = vmatmul.msk.f32.gmra.mxu3 %vm803_vm3, %v784_v35 }
 0x15a   : > { %v650_v36 = vpop.f32.mrf.mxu0  ;;  %v758_v39 = vpop.f32.mrf.mxu1 }
 0x15b   : > { %v1269_v37 = vpop.eup %1268  ;;  %v651_v38 = vadd.f32 %v1572_v41, %v650_v36 }
 0x15c   : > { %v697_v40 = vmul.f32 %v1269_v37, %v1578_v45 }
 0x15d   : > { %1270 = vtanh.f32 %v651_v38 }
 0x15e   : > { %v785_v42 = vadd.f32 %v755_v31, %v697_v40 }
 0x160   : > { %1174 = vmatmul.msk.f32.gmra.mxu2 %vm803_vm3, %v785_v42  ;;  %1191 = vmatmul.msk.f32.gmra.mxu3 %vm803_vm3, %v785_v42 }
 0x162   : > { %v653_v43 = vpop.f32.mrf.mxu0  ;;  %v761_v48 = vpop.f32.mrf.mxu1 }
 0x163   : > { %v1271_v44 = vpop.eup %1270  ;;  %v654_v46 = vadd.f32 %v1572_v41, %v653_v43 }
 0x164   : > { %v698_v47 = vmul.f32 %v1271_v44, %v1578_v45 }
 0x165   : > { %1272 = vtanh.f32 %v654_v46 }
 0x166   : > { %v786_v49 = vadd.f32 %v758_v39, %v698_v47 }
 0x168   : > { %1175 = vmatmul.msk.f32.gmra.mxu2 %vm803_vm3, %v786_v49  ;;  %1192 = vmatmul.msk.f32.gmra.mxu3 %vm803_vm3, %v786_v49 }
 0x16a   : > { %v656_v50 = vpop.f32.mrf.mxu0  ;;  %v764_v55 = vpop.f32.mrf.mxu1 }
 0x16b   : > { %v1273_v51 = vpop.eup %1272  ;;  %v657_v52 = vadd.f32 %v1572_v41, %v656_v50 }
 0x16c   : > { %v699_v53 = vmul.f32 %v1273_v51, %v1578_v45 }
 0x16d   : > { %1274 = vtanh.f32 %v657_v52 }
 0x16e   : > { %v787_v54 = vadd.f32 %v761_v48, %v699_v53 }
 0x170   : > { %1176 = vmatmul.msk.f32.gmra.mxu2 %vm803_vm3, %v787_v54  ;;  %1193 = vmatmul.msk.f32.gmra.mxu3 %vm803_vm3, %v787_v54 }
 0x172   : > { %v659_v56 = vpop.f32.mrf.mxu0  ;;  %v767_v61 = vpop.f32.mrf.mxu1 }
 0x173   : > { %v1275_v57 = vpop.eup %1274  ;;  %v660_v58 = vadd.f32 %v1572_v41, %v659_v56 }
 0x174   : > { %v700_v59 = vmul.f32 %v1275_v57, %v1578_v45 }
 0x175   : > { %1276 = vtanh.f32 %v660_v58 }
 0x176   : > { %v788_v60 = vadd.f32 %v764_v55, %v700_v59 }
 0x178   : > { %1177 = vmatmul.msk.f32.gmra.mxu2 %vm803_vm3, %v788_v60  ;;  %1194 = vmatmul.msk.f32.gmra.mxu3 %vm803_vm3, %v788_v60 }
 0x17a   : > { %v662_v62 = vpop.f32.mrf.mxu0  ;;  %v770_v5 = vpop.f32.mrf.mxu1 }
 0x17b   : > { %v1277_v63 = vpop.eup %1276  ;;  %v663_v0 = vadd.f32 %v1572_v41, %v662_v62 }
 0x17c   : > { %v701_v1 = vmul.f32 %v1277_v63, %v1578_v45 }
 0x17d   : > { %1278 = vtanh.f32 %v663_v0 }
 0x17e   : > { %v789_v2 = vadd.f32 %v767_v61, %v701_v1 }
 0x180   : > { %1178 = vmatmul.msk.f32.gmra.mxu2 %vm803_vm3, %v789_v2  ;;  %1195 = vmatmul.msk.f32.gmra.mxu3 %vm803_vm3, %v789_v2 }
 0x182   : > { %v665_v3 = vpop.f32.mrf.mxu0  ;;  %v773_v11 = vpop.f32.mrf.mxu1 }
 0x183   : > { %v1279_v4 = vpop.eup %1278  ;;  %v666_v6 = vadd.f32 %v1572_v41, %v665_v3  ;;  %v1646_v41 = vld [vmem:[%s1735_s8] ss:$0 sm:$0xff] }
 0x184   : > { %v702_v7 = vmul.f32 %v1279_v4, %v1578_v45 }
 0x185   : > { %1280 = vtanh.f32 %v666_v6 }
 0x186   : > { %v790_v8 = vadd.f32 %v770_v5, %v702_v7 }
 0x188   : > { %1179 = vmatmul.msk.f32.gmra.mxu2 %vm803_vm3, %v790_v8  ;;  %1196 = vmatmul.msk.f32.gmra.mxu3 %vm803_vm3, %v790_v8 }
 0x18b   : > { %v1281_v9 = vpop.eup %1280 }
 0x18c   : > { %v703_v10 = vmul.f32 %v1281_v9, %v1578_v45  ;;  %v1652_v45 = vld [vmem:[%s1736_s9] ss:$0 sm:$0xff] }
 0x18e   : > { %v791_v12 = vadd.f32 %v773_v11, %v703_v10 }
 0x190   : > { %1180 = vmatmul.msk.f32.gmra.mxu2 %vm803_vm3, %v791_v12  ;;  %1197 = vmatmul.msk.f32.gmra.mxu3 %vm803_vm3, %v791_v12 }
 0x19b   : > { %v873_v13 = vpop.f32.mrf.mxu2  ;;  %v984_v14 = vpop.f32.mrf.mxu3 }
 0x19c   : > { %v874_v15 = vadd.f32 %v1646_v41, %v873_v13 }
 0x19e   : > { %1282 = vtanh.f32 %v874_v15 }
 0x1a3   : > { %v876_v16 = vpop.f32.mrf.mxu2  ;;  %v987_v17 = vpop.f32.mrf.mxu3 }
 0x1a4   : > { %v1283_v18 = vpop.eup %1282  ;;  %v877_v19 = vadd.f32 %v1646_v41, %v876_v16 }
 0x1a5   : > { %v941_v20 = vmul.f32 %v1283_v18, %v1652_v45 }
 0x1a6   : > { %1284 = vtanh.f32 %v877_v19 }
 0x1a7   : > { %v1032_v21 = vadd.f32 %v984_v14, %v941_v20 }
 0x1a9   : > { %1049 = vst.msk [vmem:[%s1661_s15] sm:$0xff] %vm1048_vm4, %v1032_v21 }
 0x1ab   : > { %v879_v22 = vpop.f32.mrf.mxu2  ;;  %v990_v23 = vpop.f32.mrf.mxu3 }
 0x1ac   : > { %v1285_v24 = vpop.eup %1284  ;;  %v880_v25 = vadd.f32 %v1646_v41, %v879_v22 }
 0x1ad   : > { %v942_v26 = vmul.f32 %v1285_v24, %v1652_v45 }
 0x1ae   : > { %1286 = vtanh.f32 %v880_v25 }
 0x1af   : > { %v1033_v27 = vadd.f32 %v987_v17, %v942_v26 }
 0x1b1   : > { %1050 = vst.msk [vmem:[%s1661_s15 + $0x8] sm:$0xff] %vm1048_vm4, %v1033_v27 }
 0x1b3   : > { %v882_v28 = vpop.f32.mrf.mxu2  ;;  %v993_v29 = vpop.f32.mrf.mxu3 }
 0x1b4   : > { %v1287_v30 = vpop.eup %1286  ;;  %v883_v31 = vadd.f32 %v1646_v41, %v882_v28 }
 0x1b5   : > { %v943_v32 = vmul.f32 %v1287_v30, %v1652_v45 }
 0x1b6   : > { %1288 = vtanh.f32 %v883_v31 }
 0x1b7   : > { %v1034_v33 = vadd.f32 %v990_v23, %v943_v32 }
 0x1b9   : > { %1051 = vst.msk [vmem:[%s1661_s15 + $0x10] sm:$0xff] %vm1048_vm4, %v1034_v33 }
 0x1bb   : > { %v885_v34 = vpop.f32.mrf.mxu2  ;;  %v996_v35 = vpop.f32.mrf.mxu3 }
 0x1bc   : > { %v1289_v36 = vpop.eup %1288  ;;  %v886_v37 = vadd.f32 %v1646_v41, %v885_v34 }
 0x1bd   : > { %v944_v38 = vmul.f32 %v1289_v36, %v1652_v45 }
 0x1be   : > { %1290 = vtanh.f32 %v886_v37 }
 0x1bf   : > { %v1035_v39 = vadd.f32 %v993_v29, %v944_v38 }
 0x1c1   : > { %1052 = vst.msk [vmem:[%s1661_s15 + $0x18] sm:$0xff] %vm1048_vm4, %v1035_v39 }
 0x1c3   : > { %v888_v40 = vpop.f32.mrf.mxu2  ;;  %v999_v42 = vpop.f32.mrf.mxu3 }
 0x1c4   : > { %v1291_v43 = vpop.eup %1290  ;;  %v889_v44 = vadd.f32 %v1646_v41, %v888_v40 }
 0x1c5   : > { %v945_v46 = vmul.f32 %v1291_v43, %v1652_v45 }
 0x1c6   : > { %1292 = vtanh.f32 %v889_v44 }
 0x1c7   : > { %v1036_v47 = vadd.f32 %v996_v35, %v945_v46 }
 0x1c9   : > { %1053 = vst.msk [vmem:[%s1661_s15 + $0x20] sm:$0xff] %vm1048_vm4, %v1036_v47 }
 0x1cb   : > { %v891_v48 = vpop.f32.mrf.mxu2  ;;  %v1002_v49 = vpop.f32.mrf.mxu3 }
 0x1cc   : > { %v1293_v50 = vpop.eup %1292  ;;  %v892_v51 = vadd.f32 %v1646_v41, %v891_v48 }
 0x1cd   : > { %v946_v52 = vmul.f32 %v1293_v50, %v1652_v45 }
 0x1ce   : > { %1294 = vtanh.f32 %v892_v51 }
 0x1cf   : > { %v1037_v53 = vadd.f32 %v999_v42, %v946_v52 }
 0x1d1   : > { %1054 = vst.msk [vmem:[%s1661_s15 + $0x28] sm:$0xff] %vm1048_vm4, %v1037_v53 }
 0x1d3   : > { %v894_v54 = vpop.f32.mrf.mxu2  ;;  %v1005_v55 = vpop.f32.mrf.mxu3 }
 0x1d4   : > { %v1295_v56 = vpop.eup %1294  ;;  %v895_v57 = vadd.f32 %v1646_v41, %v894_v54 }
 0x1d5   : > { %v947_v58 = vmul.f32 %v1295_v56, %v1652_v45 }
 0x1d6   : > { %1296 = vtanh.f32 %v895_v57 }
 0x1d7   : > { %v1038_v59 = vadd.f32 %v1002_v49, %v947_v58 }
 0x1d9   : > { %1055 = vst.msk [vmem:[%s1661_s15 + $0x30] sm:$0xff] %vm1048_vm4, %v1038_v59 }
 0x1db   : > { %v897_v60 = vpop.f32.mrf.mxu2  ;;  %v1008_v61 = vpop.f32.mrf.mxu3 }
 0x1dc   : > { %v1297_v62 = vpop.eup %1296  ;;  %v898_v63 = vadd.f32 %v1646_v41, %v897_v60 }
 0x1dd   : > { %v948_v0 = vmul.f32 %v1297_v62, %v1652_v45 }
 0x1de   : > { %1298 = vtanh.f32 %v898_v63 }
 0x1df   : > { %v1039_v1 = vadd.f32 %v1005_v55, %v948_v0 }
 0x1e1   : > { %1056 = vst.msk [vmem:[%s1661_s15 + $0x38] sm:$0xff] %vm1048_vm4, %v1039_v1 }
 0x1e3   : > { %v900_v2 = vpop.f32.mrf.mxu2  ;;  %v1011_v3 = vpop.f32.mrf.mxu3 }
 0x1e4   : > { %v1299_v4 = vpop.eup %1298  ;;  %v901_v5 = vadd.f32 %v1646_v41, %v900_v2 }
 0x1e5   : > { %v949_v6 = vmul.f32 %v1299_v4, %v1652_v45 }
 0x1e6   : > { %1300 = vtanh.f32 %v901_v5 }
 0x1e7   : > { %v1040_v7 = vadd.f32 %v1008_v61, %v949_v6 }
 0x1e9   : > { %1057 = vst.msk [vmem:[%s1661_s15 + $0x40] sm:$0xff] %vm1048_vm4, %v1040_v7 }
 0x1eb   : > { %v903_v8 = vpop.f32.mrf.mxu2  ;;  %v1014_v11 = vpop.f32.mrf.mxu3 }
 0x1ec   : > { %v1301_v9 = vpop.eup %1300  ;;  %v904_v10 = vadd.f32 %v1646_v41, %v903_v8 }
 0x1ed   : > { %v950_v12 = vmul.f32 %v1301_v9, %v1652_v45 }
 0x1ee   : > { %1302 = vtanh.f32 %v904_v10 }
 0x1ef   : > { %v1041_v13 = vadd.f32 %v1011_v3, %v950_v12 }
 0x1f1   : > { %1058 = vst.msk [vmem:[%s1661_s15 + $0x48] sm:$0xff] %vm1048_vm4, %v1041_v13 }
 0x1f3   : > { %v906_v14 = vpop.f32.mrf.mxu2  ;;  %v1017_v18 = vpop.f32.mrf.mxu3 }
 0x1f4   : > { %v1303_v15 = vpop.eup %1302  ;;  %v907_v16 = vadd.f32 %v1646_v41, %v906_v14 }
 0x1f5   : > { %v951_v17 = vmul.f32 %v1303_v15, %v1652_v45 }
 0x1f6   : > { %1304 = vtanh.f32 %v907_v16 }
 0x1f7   : > { %v1042_v19 = vadd.f32 %v1014_v11, %v951_v17 }
 0x1f9   : > { %1059 = vst.msk [vmem:[%s1661_s15 + $0x50] sm:$0xff] %vm1048_vm4, %v1042_v19 }
 0x1fb   : > { %v909_v20 = vpop.f32.mrf.mxu2  ;;  %v1020_v25 = vpop.f32.mrf.mxu3 }
 0x1fc   : > { %v1305_v21 = vpop.eup %1304  ;;  %v910_v22 = vadd.f32 %v1646_v41, %v909_v20 }
 0x1fd   : > { %v952_v23 = vmul.f32 %v1305_v21, %v1652_v45 }
 0x1fe   : > { %1306 = vtanh.f32 %v910_v22 }
 0x1ff   : > { %v1043_v24 = vadd.f32 %v1017_v18, %v952_v23 }
 0x201   : > { %1060 = vst.msk [vmem:[%s1661_s15 + $0x58] sm:$0xff] %vm1048_vm4, %v1043_v24 }
 0x203   : > { %v912_v26 = vpop.f32.mrf.mxu2  ;;  %v1023_v31 = vpop.f32.mrf.mxu3 }
 0x204   : > { %v1307_v27 = vpop.eup %1306  ;;  %v913_v28 = vadd.f32 %v1646_v41, %v912_v26 }
 0x205   : > { %v953_v29 = vmul.f32 %v1307_v27, %v1652_v45 }
 0x206   : > { %1308 = vtanh.f32 %v913_v28 }
 0x207   : > { %v1044_v30 = vadd.f32 %v1020_v25, %v953_v29 }
 0x209   : > { %1061 = vst.msk [vmem:[%s1661_s15 + $0x60] sm:$0xff] %vm1048_vm4, %v1044_v30 }
 0x20b   : > { %v915_v32 = vpop.f32.mrf.mxu2  ;;  %v1026_v39 = vpop.f32.mrf.mxu3 }
 0x20c   : > { %v1309_v33 = vpop.eup %1308  ;;  %v916_v34 = vadd.f32 %v1646_v41, %v915_v32 }
 0x20d   : > { %v954_v35 = vmul.f32 %v1309_v33, %v1652_v45 }
 0x20e   : > { %1310 = vtanh.f32 %v916_v34 }
 0x20f   : > { %v1045_v36 = vadd.f32 %v1023_v31, %v954_v35 }
 0x211   : > { %1062 = vst.msk [vmem:[%s1661_s15 + $0x68] sm:$0xff] %vm1048_vm4, %v1045_v36 }
 0x213   : > { %v918_v37 = vpop.f32.mrf.mxu2  ;;  %v1029_v47 = vpop.f32.mrf.mxu3 }
 0x214   : > { %v1311_v38 = vpop.eup %1310  ;;  %v919_v40 = vadd.f32 %v1646_v41, %v918_v37 }
 0x215   : > { %v955_v42 = vmul.f32 %v1311_v38, %v1652_v45 }
 0x216   : > { %1312 = vtanh.f32 %v919_v40 }
 0x217   : > { %v1046_v43 = vadd.f32 %v1026_v39, %v955_v42 }
 0x219   : > { %1063 = vst.msk [vmem:[%s1661_s15 + $0x70] sm:$0xff] %vm1048_vm4, %v1046_v43 }
 0x21c   : > { %v1313_v44 = vpop.eup %1312 }
 0x21d   : > { %v956_v46 = vmul.f32 %v1313_v44, %v1652_v45 }
 0x21f   : > { %v1047_v48 = vadd.f32 %v1029_v47, %v956_v46 }
 0x221   : > { %1064 = vst.msk [vmem:[%s1661_s15 + $0x78] sm:$0xff] %vm1048_vm4, %v1047_v48 }
 0x222 PF: > { %s21_s17 = sadd.s32 1, %s1320_s17  }
 0x223   : > { %p18_p4 = scmp.ge.s32.totalorder %s21_s17, 4  }
 0x225   :  { %20 = sbr.rel (!%p18_p4) target bundleno = 1 (0x1), region = 94 }

</bundles_post_ra>
